<compile_context>
chip_gen: v6e
topology: v6e:2x2x1
jax: 0.10.0
libtpu: 0.0.40
codegen_flags: <defaults>
</compile_context>

<pallas_src>
from typing import Callable, Optional

import jax
import jax.numpy as jnp
from jax.experimental import pallas as pl
from jax.experimental.pallas import tpu as pltpu


_LANE_CHOICES = (1024, 512, 256, 128)   # lane-dense widths (multiples of 128)
_DEFAULT_TILE_BYTES = 8 << 20           # ~8 MiB/tile: >=90% HBM roofline on v5e/v6e/v7x;
                                        # 2x8 MiB double-buffered input fits scoped VMEM
                                        # on all generations (incl. v7x's 64 MiB physical).


def _make_nan_count_kernel(tile_rows: int, rem_rows: int):
    """Build the reduction-only NaN-count kernel.

    x_ref:    (tile_rows, lane) VMEM tile of the flattened input (read-only).
    part_ref: (1, 1, lane) int32 per-tile partial counts (per-lane sums).

    rem_rows == 0  -> every tile is full: bare isnan + sublane-sum (hot path,
                      memory-bound on every generation).
    rem_rows  > 0  -> the last grid step's DMA is clipped at the array edge;
                      that step reads only the `rem_rows` valid rows (static
                      slice), so undefined VMEM never contributes and the hot
                      path stays completely mask-free.
    """

    def _store(part_ref, nan_mask):
        part = jnp.sum(nan_mask.astype(jnp.int32), axis=0, keepdims=True)   # (1, lane)
        part_ref[...] = part.reshape(part_ref.shape)                        # (1, 1, lane)

    # TODO(synk): v5e bf16/f16 fast path — integer NaN bit test on u32-packed
    # pairs (pltpu.bitcast) to avoid the f32 unpack on a VPU without bf16
    # support; jnp.isnan is used for all float dtypes here.

    if rem_rows == 0:
        def kernel(x_ref, part_ref):
            _store(part_ref, jnp.isnan(x_ref[...]))
        return kernel

    def kernel(x_ref, part_ref):
        i = pl.program_id(0)
        last = pl.num_programs(0) - 1

        @pl.when(i != last)
        def _full_tile():
            _store(part_ref, jnp.isnan(x_ref[...]))

        @pl.when(i == last)
        def _edge_tile():
            # Only the first rem_rows rows of this tile were DMA'd; read just
            # those (static slice -> no iota / compare / AND work at all).
            _store(part_ref, jnp.isnan(x_ref[:rem_rows, :]))

    return kernel


def _pallas_nan_count(x: jax.Array, *, target_tile_bytes: int = _DEFAULT_TILE_BYTES):
    """Total number of NaNs in `x` (int32 scalar), via a read-only Pallas reduction."""
    if not jnp.issubdtype(x.dtype, jnp.floating):
        return jnp.int32(0)          # matches torch.isnan semantics for non-float data
    n = int(x.size)
    if n == 0:
        return jnp.int32(0)

    if n % 128:
        # Ragged total element count (rare for NN activations).  Padding or
        # slicing to a lane multiple would copy the whole tensor (~3x the HBM
        # traffic of the reduction itself), so use a single-pass, read-only
        # XLA reduction for this cold path instead.
        # TODO(synk): zero-copy Pallas path for n % 128 != 0 (needs a 1-D /
        # pl.ANY manual-DMA kernel with lane masking of the final partial row).
        return jnp.isnan(x).sum(dtype=jnp.int32)

    flat = x.reshape(-1)             # row-major flatten: free, no data movement

    # Lane-dense slab: widest lane width (multiple of 128) dividing n.
    lane = next(l for l in _LANE_CHOICES if n % l == 0)
    m = n // lane
    slab = flat.reshape(m, lane)

    itemsize = jnp.dtype(x.dtype).itemsize
    # Dtype-native sublane multiple: f32 -> 8, bf16/f16 -> 16, int8/fp8 -> 32.
    sub = max(8, 32 // itemsize)

    if m <= sub:
        tm = m                                              # full-extent block
    else:
        # Biggest sublane-multiple row count within the per-tile byte budget...
        budget = max(sub, (target_tile_bytes // (lane * itemsize)) // sub * sub)
        # ...capped at ~half the rows (rounded up to the sublane multiple) so
        # the "parallel" grid axis always has >= 2 steps and shards across
        # both TensorCores on v7x.  No effect on single-TC v5e/v6e.
        half = (-(-m // 2) + sub - 1) // sub * sub
        tm = max(sub, min(budget, half))
    grid = -(-m // tm)                                      # cdiv
    rem = m % tm                                            # rows in the clipped edge tile

    tile_bytes = tm * lane * itemsize
    # Double-buffered input + tiny int32 partials + slack; scales with tile size.
    vmem_limit = int(min(2 * tile_bytes + (4 << 20), 48 << 20))

    partials = pl.pallas_call(
        _make_nan_count_kernel(tm, rem),
        out_shape=jax.ShapeDtypeStruct((grid, 1, lane), jnp.int32),
        grid_spec=pltpu.PrefetchScalarGridSpec(
            num_scalar_prefetch=0,
            grid=(grid,),
            in_specs=[pl.BlockSpec((tm, lane), lambda i: (i, 0))],
            out_specs=pl.BlockSpec((1, 1, lane), lambda i: (i, 0, 0)),
        ),
        compiler_params=pltpu.CompilerParams(
            # Disjoint per-tile partial outputs, no cross-iteration carry:
            # the grid axis is truly parallel (megacore-shardable on v7x).
            dimension_semantics=("parallel",),
            vmem_limit_bytes=vmem_limit,
        ),
    )(slab)

    return jnp.sum(partials)          # tiny (grid, 1, lane) final reduce in XLA


class PrintPallas:
    """JAX/Pallas port of the PyTorch `Print` module.

    Parameters mirror the original: name, mode ("shape" | "value" | "nan"),
    and an optional transform applied before printing in "value" mode.
    Forward is an identity passthrough (the input is returned unchanged, no
    device copy); mode="nan" runs a read-only Pallas NaN-count reduction.
    Runtime values are printed with jax.debug.print so the module also behaves
    correctly when called under jax.jit (no tracer printing).
    """

    def __init__(self, name: Optional[str] = None, mode=False,
                 transform: Optional[Callable] = None):
        self.name = name
        self.mode = mode
        self.transform = transform

    def __call__(self, x: jax.Array) -> jax.Array:
        if self.name is not None:
            print(f"{self.name}:")

        if self.mode == "value":
            # Matches the PyTorch semantics: in "value" mode the transformed
            # tensor is what gets printed *and* returned.
            if self.transform is not None:
                x = self.transform(x)
            jax.debug.print("{v}", v=x)
        elif self.mode == "nan":
            count = _pallas_nan_count(x)
            denom = jnp.float32(x.size if x.size else 1)
            jax.debug.print("{v}", v=count.astype(jnp.float32) / denom)
        else:
            print(tuple(x.shape))
        return x                       # identity: no copy, no kernel


if __name__ == "__main__":
    key = jax.random.PRNGKey(0)
    # Small NCHW-style input consistent with typical usage of the module.
    x = jax.random.normal(key, (2, 4, 16, 16), dtype=jnp.float32)

    # mode="shape" (default): pure identity passthrough, prints shape.
    mod_shape = PrintPallas(name="activations", mode="shape")
    y = jax.block_until_ready(mod_shape(x))
    assert y is x and y.shape == x.shape and y.dtype == x.dtype

    # mode="nan": fraction of NaNs via the read-only Pallas reduction kernel.
    x_nan = x.at[0, 0, 0, 0].set(jnp.nan).at[1, 3, 5, 7].set(jnp.nan)
    mod_nan = PrintPallas(name="activations", mode="nan")
    y2 = jax.block_until_ready(mod_nan(x_nan))
    assert y2 is x_nan
    cnt = jax.block_until_ready(_pallas_nan_count(x_nan))
    assert int(cnt) == 2, int(cnt)

    # Multi-tile path with a clipped ragged edge tile (grid=5, rem=1 row).
    big = jax.random.normal(jax.random.PRNGKey(1), (33, 1024), dtype=jnp.float32)
    big = big.at[0, 0].set(jnp.nan).at[32, 1023].set(jnp.nan).at[17, 511].set(jnp.nan)
    cnt_big = jax.block_until_ready(
        _pallas_nan_count(big, target_tile_bytes=8 * 1024 * 4))
    assert int(cnt_big) == 3, int(cnt_big)

    # Unmasked multi-tile path: v7x two-TC split forces grid=2 even though the
    # whole slab would fit in one 8 MiB tile.
    med = jax.random.normal(jax.random.PRNGKey(3), (1024, 256), dtype=jnp.float32)
    med = med.at[5, 100].set(jnp.nan).at[800, 3].set(jnp.nan)
    cnt_med = jax.block_until_ready(_pallas_nan_count(med))
    assert int(cnt_med) == 2, int(cnt_med)

    # bf16 path (sublane multiple 16, isnan on bf16).
    xb = x.astype(jnp.bfloat16).at[1, 2, 3, 4].set(jnp.nan)
    cnt_bf16 = jax.block_until_ready(_pallas_nan_count(xb))
    assert int(cnt_bf16) == 1, int(cnt_bf16)

    # Ragged total element count (not a multiple of 128): read-only XLA fallback.
    small = jax.random.normal(jax.random.PRNGKey(2), (3, 5, 7), dtype=jnp.float32)
    small = small.at[1, 2, 3].set(jnp.nan)
    cnt_small = jax.block_until_ready(_pallas_nan_count(small))
    assert int(cnt_small) == 1, int(cnt_small)

    # Non-float input: count is 0, as with torch.isnan on integral data.
    cnt_int = jax.block_until_ready(_pallas_nan_count(jnp.arange(16, dtype=jnp.int32)))
    assert int(cnt_int) == 0, int(cnt_int)

    # mode="value" with a transform (returns the transformed tensor, as in torch).
    mod_val = PrintPallas(name="activations", mode="value",
                          transform=lambda t: t.mean(axis=(-2, -1)))
    y3 = jax.block_until_ready(mod_val(x))
    assert y3.shape == (2, 4)

    print("KERNEL_OK")
</pallas_src>

<mosaic_0001>
module attributes {stable_mosaic.version = 11 : i64} {
  func.func @kernel(%arg0: i32, %arg1: memref<2x1024xf32, #tpu.memory_space<vmem>>, %arg2: memref<1x1x1024xi32, #tpu.memory_space<vmem>>) attributes {dimension_semantics = [#tpu.dimension_semantics<parallel>], iteration_bounds = array<i64: 1>, scalar_prefetch = 0 : i64, scratch_operands = 0 : i64, tpu.core_type = #tpu.core_type<tc>, window_params = [{transform_indices = @transform_0, window_bounds = array<i64: 2, 1024>}, {transform_indices = @transform_1, window_bounds = array<i64: 1, 1, 1024>}]} {
    %c0 = arith.constant 0 : index
    %c0_0 = arith.constant 0 : index
    %0 = vector.load %arg1[%c0, %c0_0] : memref<2x1024xf32, #tpu.memory_space<vmem>>, vector<2x1024xf32>
    %1 = arith.cmpf one, %0, %0 : vector<2x1024xf32>
    %2 = arith.extui %1 : vector<2x1024xi1> to vector<2x1024xi32>
    %cst = arith.constant dense<0> : vector<1024xi32>
    %3 = vector.multi_reduction <add>, %2, %cst [0] : vector<2x1024xi32> to vector<1024xi32>
    %4 = vector.shape_cast %3 : vector<1024xi32> to vector<1x1024xi32>
    %5 = vector.shape_cast %4 : vector<1x1024xi32> to vector<1x1x1024xi32>
    %c0_1 = arith.constant 0 : index
    %c0_2 = arith.constant 0 : index
    %c0_3 = arith.constant 0 : index
    %6 = vector.load %arg2[%c0_1, %c0_2, %c0_3] : memref<1x1x1024xi32, #tpu.memory_space<vmem>>, vector<1x1x1024xi32>
    tpu.vector_store %arg2[%c0_1, %c0_2, %c0_3], %5 {strides = array<i32>} : memref<1x1x1024xi32, #tpu.memory_space<vmem>>, vector<1x1x1024xi32>,
    return
  }
  func.func @transform_0(%arg0: i32) -> (i32, i32) {
    %c0_i32 = arith.constant 0 : i32
    %c0_i32_0 = arith.constant 0 : i32
    return %arg0, %c0_i32 : i32, i32
  }
  func.func @transform_1(%arg0: i32) -> (i32, i32, i32) {
    %c0_i32 = arith.constant 0 : i32
    %c0_i32_0 = arith.constant 0 : i32
    %c0_i32_1 = arith.constant 0 : i32
    return %arg0, %c0_i32, %c0_i32_0 : i32, i32, i32
  }
}

</mosaic_0001>

<bundles_post_ra>
// kernel: tpu_custom_call.1
= control target key start
LH: loop header
LB: loop body
LE: loop exit
PB: predicated region body
PF: predicated region fallthrough
CT: control target
= control target key end

     0   :  { %6 = vsyncpa [#allocation3], 0  ;;  %s269_s0 = inlined_call_operand.hbm [shape: f32[2,1024], index: 0, kind: input, shape index: {}]   ;;  %s270_s1 = inlined_call_operand.hbm [shape: s32[1,1,1024], index: 1, kind: output, shape index: {}]  }
   0x1   :  { %7 = vsyncpa [#allocation4], 0  ;;  %s232_s6 = smov [#allocation2]  }
   0x2   :  { %s14_s7 = sshll.u32 %s232_s6, 4  ;;  %s15_s7 = int_to_ptr.vmem [resolvable:$true] %s14_s7 }
   0x3   :  { %s196_s8 = scalar_lea.vmem %s15_s7, 256  ;;  %p201_p1 = scmp.lt.s32.totalorder %s15_s7, %s15_s7 }
   0x4   :  { %p197_p0 = scmp.ne.s32.totalorder %s15_s7, %s196_s8  ;;  %p202_p2 = scmp.lt.s32.totalorder %s196_s8, %s196_s8 }
   0x6   :  { %p203_p3 = por %p202_p2, %p201_p1 }
   0x8   :  { %p204_p4 = pnand %p203_p3, %p197_p0 }
   0xa   :  { %207 = shalt.err (!%p204_p4)
}
   0xb   :  { %17 = dma.hbm_to_vmem [thread:$0]  %s269_s0, 256, %s15_s7, [#allocation3]  }
   0xc   :  { %228 = dma.done.wait [#allocation3], 256  }
   0xd   :  { %229 = vsyncadd [#allocation3], 4294967040  ;;  %v31_v0 = vlaneseq  ;;  %v233_v1 = vmov 1983009808   ;;  %v234_v5 = vmov 1966171168  }
   0xe   :  { %v29_v2 = vunpack.c.l.s4 %v233_v1  ;;  %v123_v6 = vunpack.c.l.s4 %v234_v5  ;;  %v21_v8 = vld [vmem:[#allocation2] sm:$0xff]  ;;  %v22_v9 = vld [vmem:[#allocation2 + $0x8] sm:$0xff]  ;;  %v235_v10 = vmov 0   ;;  %vm61_vm2 = vcmask 1041408   ;;  %s236_s0 = smov [#allocation5]  }
   0xf   :  { %v32_v3 = vshrl.u32 %v31_v0, 7  ;;  %vm23_vm0 = vcmp.ne.f32.partialorder %v21_v8, %v21_v8  ;;  %vm24_vm1 = vcmp.ne.f32.partialorder %v22_v9, %v22_v9  ;;  %s174_s11 = sshll.u32 %s236_s0, 4  ;;  %s175_s11 = int_to_ptr.vmem [resolvable:$true] %s174_s11 }
  0x10   :  { %v30_v4 = vunpack.c.0.s8 %v29_v2  ;;  %v25_v11 = vsel %vm23_vm0, 1, %v235_v10  ;;  %v26_v12 = vsel %vm24_vm1, 1, %v235_v10  ;;  %v124_v13 = vunpack.c.0.s8 %v123_v6  ;;  %s208_s12 = scalar_lea.vmem %s175_s11, 128  ;;  %p213_p6 = scmp.lt.s32.totalorder %s175_s11, %s175_s11 }
  0x11   :  { %v27_v14 = vcombine.high %v25_v11, %v25_v11  ;;  %v44_v16 = vcombine.high %v26_v12, %v26_v12  ;;  %p209_p5 = scmp.ne.s32.totalorder %s175_s11, %s208_s12  ;;  %p214_p7 = scmp.lt.s32.totalorder %s208_s12, %s208_s12 }
  0x12   :  { %v33_v7 = vsub.s32 %v30_v4, %v32_v3  ;;  %v252_v24 = vsub.s32 %v124_v13, %v32_v3 }
  0x13   :  { %p215_p8 = por %p214_p7, %p213_p6 }
  0x14   :  { %v34_v15 = vrot.slane %v25_v11, %v33_v7  ;;  %v51_v17 = vrot.slane %v26_v12, %v33_v7  ;;  %v41_v18 = vrot.slane %v27_v14, %v33_v7  ;;  %v58_v20 = vrot.slane %v44_v16, %v33_v7 }
  0x15   :  { %p216_p9 = pnand %p215_p8, %p209_p5 }
  0x16   :  { %v42_v19 = vcombine.high %v34_v15, %v34_v15  ;;  %v59_v21 = vcombine.high %v51_v17, %v51_v17  ;;  %v62_v22 = vsel %vm61_vm2, %v34_v15, 0  ;;  %v90_v23 = vsel %vm61_vm2, %v51_v17, 0 }
  0x17   :  { %v43_v25 = vcombine.high %v41_v18, %v41_v18  ;;  %v60_v26 = vcombine.high %v58_v20, %v58_v20  ;;  %v63_v27 = vrot.slane %v62_v22, 4  ;;  %v76_v30 = vsel %vm61_vm2, %v41_v18, 0 }
  0x18   :  { %v69_v28 = vsel %vm61_vm2, %v42_v19, 0  ;;  %v91_v31 = vrot.slane %v90_v23, 4  ;;  %v97_v32 = vsel %vm61_vm2, %v59_v21, 0  ;;  %v77_v34 = vrot.slane %v76_v30, 4 }
  0x19   :  { %v70_v29 = vrot.slane %v69_v28, 4  ;;  %v64_v33 = vadd.s32 %v63_v27, %v62_v22  ;;  %v83_v35 = vsel %vm61_vm2, %v43_v25, 0  ;;  %v98_v36 = vrot.slane %v97_v32, 4 }
  0x1a   :  { %v84_v38 = vrot.slane %v83_v35, 4  ;;  %v92_v39 = vadd.s32 %v91_v31, %v90_v23  ;;  %v104_v40 = vsel %vm61_vm2, %v58_v20, 0  ;;  %v78_v42 = vadd.s32 %v77_v34, %v76_v30 }
  0x1b   :  { %v71_v37 = vadd.s32 %v70_v29, %v69_v28  ;;  %v65_v41 = vrot.slane %v64_v33, 2  ;;  %v99_v43 = vadd.s32 %v98_v36, %v97_v32  ;;  %v105_v44 = vrot.slane %v104_v40, 4 }
  0x1c   :  { %v85_v46 = vadd.s32 %v84_v38, %v83_v35  ;;  %v93_v47 = vrot.slane %v92_v39, 2  ;;  %v111_v48 = vsel %vm61_vm2, %v60_v26, 0  ;;  %v79_v50 = vrot.slane %v78_v42, 2 }
  0x1d   :  { %v72_v45 = vrot.slane %v71_v37, 2  ;;  %v66_v49 = vadd.s32 %v65_v41, %v64_v33  ;;  %v100_v51 = vrot.slane %v99_v43, 2  ;;  %v106_v52 = vadd.s32 %v105_v44, %v104_v40 }
  0x1e   :  { %v86_v54 = vrot.slane %v85_v46, 2  ;;  %v94_v55 = vadd.s32 %v93_v47, %v92_v39  ;;  %v112_v56 = vrot.slane %v111_v48, 4  ;;  %v80_v58 = vadd.s32 %v79_v50, %v78_v42 }
  0x1f   :  { %v73_v53 = vadd.s32 %v72_v45, %v71_v37  ;;  %v67_v57 = vrot.slane %v66_v49, 1  ;;  %v101_v59 = vadd.s32 %v100_v51, %v99_v43  ;;  %v107_v60 = vrot.slane %v106_v52, 2 }
  0x20   :  { %v87_v62 = vadd.s32 %v86_v54, %v85_v46  ;;  %v95_v63 = vrot.slane %v94_v55, 1  ;;  %v113_v0 = vadd.s32 %v112_v56, %v111_v48  ;;  %v81_v2 = vrot.slane %v80_v58, 1 }
  0x21   :  { %v74_v61 = vrot.slane %v73_v53, 1  ;;  %v68_v1 = vadd.s32 %v67_v57, %v66_v49  ;;  %v102_v3 = vrot.slane %v101_v59, 1  ;;  %v108_v4 = vadd.s32 %v107_v60, %v106_v52 }
  0x22   :  { %v88_v6 = vrot.slane %v87_v62, 1  ;;  %v96_v7 = vadd.s32 %v95_v63, %v94_v55  ;;  %v114_v8 = vrot.slane %v113_v0, 2  ;;  %v82_v9 = vadd.s32 %v81_v2, %v80_v58 }
  0x23   :  { %v75_v5 = vadd.s32 %v74_v61, %v73_v53  ;;  %v103_v10 = vadd.s32 %v102_v3, %v101_v59  ;;  %v109_v11 = vrot.slane %v108_v4, 1 }
  0x24   :  { %v89_v12 = vadd.s32 %v88_v6, %v87_v62  ;;  %v115_v13 = vadd.s32 %v114_v8, %v113_v0 }
  0x25   :  { %v118_v14 = vcombine.low %v68_v1, %v75_v5  ;;  %v110_v15 = vadd.s32 %v109_v11, %v108_v4  ;;  %v120_v18 = vcombine.low %v96_v7, %v103_v10 }
  0x26   :  { %v116_v16 = vrot.slane %v115_v13, 1  ;;  %v119_v17 = vcombine.low %v82_v9, %v89_v12 }
  0x27   :  { %v128_v19 = vrot.slane %v118_v14, %v252_v24  ;;  %v142_v23 = vrot.slane %v120_v18, %v252_v24 }
  0x28   :  { %v117_v20 = vadd.s32 %v116_v16, %v115_v13  ;;  %v135_v21 = vrot.slane %v119_v17, %v252_v24 }
  0x2a   :  { %v121_v22 = vcombine.low %v110_v15, %v117_v20  ;;  %v150_v25 = vcombine.low %v128_v19, %v135_v21 }
  0x2c   :  { %v149_v26 = vrot.slane %v121_v22, %v252_v24  ;;  %v158_v28 = vrot.slane %v150_v25, %v252_v24 }
  0x2e   :  { %v151_v27 = vcombine.low %v142_v23, %v149_v26 }
  0x30   :  { %v165_v29 = vrot.slane %v151_v27, %v252_v24 }
  0x32   :  { %v166_v30 = vcombine.low %v158_v28, %v165_v29 }
  0x34   :  { %167 = vst [vmem:[#allocation5] sm:$0xff] %v166_v30 }
  0x35   :  { %219 = shalt.err (!%p216_p9)
}
  0x36   :  { %177 = dma.vmem_to_hbm [thread:$0]  %s175_s11, 128, %s270_s1, [#allocation4]  }
  0x37   :  { %230 = dma.done.wait [#allocation4], 128  }
  0x38   :  { %231 = vsyncadd [#allocation4], 4294967168 }
  0x39   :  { %181 = vsyncpa [#allocation3], 1 }
  0x3a   :  { %182 = vsyncpa [#allocation4], 1 }

</bundles_post_ra>
